<compile_context>
chip_gen: v7x
topology: tpu7x:2x2x1
jax: 0.10.0
libtpu: 0.0.40
codegen_flags: <defaults>
</compile_context>

<pallas_src>
import math

import jax
import jax.numpy as jnp
from jax.experimental import pallas as pl
from jax.experimental.pallas import tpu as pltpu

_LANE = 128
_FAST_PATH_BYTES = 1 << 20      # below this, plain broadcast_to beats a custom call
_TARGET_TILE_BYTES = 4 << 20    # ~4 MiB output tile per grid step (x2 buffers)


def _broadcast_kernel(row_ref, out_ref):
    # row_ref: (1, F) parameter row; constant index_map -> fetched once, VMEM resident.
    # out_ref: (TR, F) lane-dense output tile -> full-width unmasked stores.
    out_ref[...] = jnp.broadcast_to(row_ref[...], out_ref.shape)


def _sublane(itemsize):
    # Packed sublane tile height: f32 -> 8, bf16 -> 16, int8 -> 32.
    return 32 // itemsize


def _choose_row_tile(n_rows, row_bytes, sublane):
    """Rows per output tile: a multiple of `sublane`, or n_rows (full block)."""
    total = n_rows * row_bytes
    n_steps = max(1, pl.cdiv(total, _TARGET_TILE_BYTES))
    # v7x megacore: keep >=2 "parallel" blocks once the output is big enough
    # that per-step overhead (~0.35 us) is negligible.
    if total >= (2 << 20):
        n_steps = max(n_steps, 2)
    tr = pl.cdiv(n_rows, n_steps)
    tr = pl.cdiv(tr, sublane) * sublane
    if tr >= n_rows:
        return n_rows
    return tr


def _broadcast_rows(row, n_rows, tr):
    """Write `row` (shape (1, F)) into every row of an (n_rows_padded, F) array."""
    feat = row.shape[1]
    n_pad = pl.cdiv(n_rows, tr) * tr
    grid = (n_pad // tr,)
    out = pl.pallas_call(
        _broadcast_kernel,
        out_shape=jax.ShapeDtypeStruct((n_pad, feat), row.dtype),
        grid_spec=pltpu.PrefetchScalarGridSpec(
            num_scalar_prefetch=0,
            grid=grid,
            # Whole (1, F) parameter every step; constant index_map -> one DMA,
            # then it stays VMEM-resident for the rest of the grid.
            in_specs=[pl.BlockSpec((1, feat), lambda r: (0, 0))],
            # Output tile: TR rows x full feature width (lane-dense when F%128==0).
            # Default double-buffered writeback; Buffered(3) was only a few-%
            # lever per review, so we keep the safer default here.
            out_specs=pl.BlockSpec((tr, feat), lambda r: (r, 0)),
        ),
        compiler_params=pltpu.CompilerParams(
            dimension_semantics=("parallel",),
        ),
    )(row)
    return out, n_pad


def constant_forward(const_param, batch_size, *, force_pallas=False):
    """Repeat const_param (1, C, H, W) along batch -> (batch_size, C, H, W)."""
    _, C, H, W = const_param.shape
    feat = C * H * W
    itemsize = jnp.dtype(const_param.dtype).itemsize
    out_bytes = batch_size * feat * itemsize
    out_shape = (batch_size, C, H, W)

    # Fast path: tiny outputs (e.g. the module's default B=2 -> 1.5 KB).  XLA
    # fuses the broadcast into the consumer; custom-call overhead would dominate.
    if out_bytes < _FAST_PATH_BYTES and not force_pallas:
        return jnp.broadcast_to(const_param, out_shape)

    sublane = _sublane(itemsize)
    flat_param = const_param.reshape(1, feat)

    # Lane alignment: replicate the parameter row rep = lcm(feat,128)/feat
    # times so the store width is a multiple of 128 lanes.  `rep` consecutive
    # batch rows then form one lane-aligned "super-row".
    rep = _LANE // math.gcd(feat, _LANE)
    super_feat = feat * rep
    super_row_bytes = super_feat * itemsize
    use_super = (
        rep > 1
        and batch_size >= rep
        and super_row_bytes * sublane <= _TARGET_TILE_BYTES
    )

    if use_super:
        row = jnp.tile(flat_param, (1, rep))            # (1, super_feat), one-time, ~25 KB
        n_rows = pl.cdiv(batch_size, rep)               # padded batch sliced off below
        tr = _choose_row_tile(n_rows, super_row_bytes, sublane)
        out2d, n_pad = _broadcast_rows(row, n_rows, tr)
        out_flat = out2d.reshape(n_pad * rep, feat)
    else:
        # Fallback: feat already lane-aligned (rep == 1), batch < rep, or the
        # super-row would be too large.  Block feature dim equals the full
        # array dim, so the (8,128) constraint is satisfied even when feat is
        # not a multiple of 128.
        row = flat_param
        tr = _choose_row_tile(batch_size, feat * itemsize, sublane)
        out_flat, _ = _broadcast_rows(row, batch_size, tr)

    if out_flat.shape[0] != batch_size:
        out_flat = out_flat[:batch_size]
    return out_flat.reshape(out_shape)


class ConstantPallas:
    """JAX/Pallas equivalent of the PyTorch `Constant` module."""

    def __init__(self, n_channels, resolution=7, key=None):
        if key is None:
            key = jax.random.PRNGKey(0)
        # Deterministic stand-in for torch.randn(1, n_channels, res, res).
        self.input = jax.random.normal(
            key, (1, n_channels, resolution, resolution), dtype=jnp.float32
        )

    def __call__(self, batch_size, *, force_pallas=False):
        return constant_forward(self.input, batch_size, force_pallas=force_pallas)


if __name__ == "__main__":
    n_channels = 4
    resolution = 7

    module = ConstantPallas(n_channels, resolution, key=jax.random.PRNGKey(0))

    def check(batch_size, **kw):
        out = jax.block_until_ready(module(batch_size, **kw))
        ref = jnp.broadcast_to(
            module.input, (batch_size, n_channels, resolution, resolution)
        )
        assert out.shape == ref.shape, (out.shape, ref.shape)
        assert out.dtype == module.input.dtype
        assert jnp.array_equal(out, ref)
        return out

    # Module-default tiny case -> fast path (no Pallas, fused broadcast).
    check(2)
    # Force the Pallas fallback layout (batch < 32): single (2, 196) block.
    check(2, force_pallas=True)
    # Force the lane-aligned super-row layout with batch padding + slice:
    # 100 rows -> 4 super-rows of width 6272 (= 49*128), padded to 128 rows.
    check(100, force_pallas=True)

    print("KERNEL_OK")
</pallas_src>

<mosaic_0001>
module attributes {stable_mosaic.version = 11 : i64} {
  func.func @_broadcast_kernel(%arg0: i32, %arg1: memref<1x196xf32, #tpu.memory_space<vmem>>, %arg2: memref<2x196xf32, #tpu.memory_space<vmem>>) attributes {dimension_semantics = [#tpu.dimension_semantics<parallel>], iteration_bounds = array<i64: 1>, scalar_prefetch = 0 : i64, scratch_operands = 0 : i64, tpu.core_type = #tpu.core_type<tc>, window_params = [{pipeline_mode = #tpu.pipeline_mode<synchronous>, transform_indices = @transform_0, window_bounds = array<i64: 1, 196>}, {transform_indices = @transform_1, window_bounds = array<i64: 2, 196>}]} {
    %c0 = arith.constant 0 : index
    %c0_0 = arith.constant 0 : index
    %0 = vector.load %arg1[%c0, %c0_0] : memref<1x196xf32, #tpu.memory_space<vmem>>, vector<1x196xf32>
    %1 = vector.shape_cast %0 : vector<1x196xf32> to vector<1x196xf32>
    %2 = vector.broadcast %1 : vector<1x196xf32> to vector<2x196xf32>
    %c0_1 = arith.constant 0 : index
    %c0_2 = arith.constant 0 : index
    %3 = vector.load %arg2[%c0_1, %c0_2] : memref<2x196xf32, #tpu.memory_space<vmem>>, vector<2x196xf32>
    tpu.vector_store %arg2[%c0_1, %c0_2], %2 {strides = array<i32>} : memref<2x196xf32, #tpu.memory_space<vmem>>, vector<2x196xf32>,
    return
  }
  func.func @transform_0(%arg0: i32) -> (i32, i32) {
    %c0_i32 = arith.constant 0 : i32
    %c0_i32_0 = arith.constant 0 : i32
    %c0_i32_1 = arith.constant 0 : i32
    return %c0_i32, %c0_i32_0 : i32, i32
  }
  func.func @transform_1(%arg0: i32) -> (i32, i32) {
    %c0_i32 = arith.constant 0 : i32
    %c0_i32_0 = arith.constant 0 : i32
    return %arg0, %c0_i32 : i32, i32
  }
}

</mosaic_0001>

<bundles_post_ra>
// kernel: tpu_custom_call.1
= control target key start
LH: loop header
LB: loop body
LE: loop exit
PB: predicated region body
PF: predicated region fallthrough
CT: control target
= control target key end

     0   :  { %6 = vsyncpa [#allocation3], 0  ;;  %s147_s0 = inlined_call_operand.hbm [shape: f32[1,196], index: 0, kind: input, shape index: {}]   ;;  %s148_s1 = inlined_call_operand.hbm [shape: f32[2,196], index: 1, kind: output, shape index: {}]  }
   0x1   :  { %7 = vsyncpa [#allocation4], 0  ;;  %s110_s6 = smov [#allocation2]   ;;  %s62_s10 = scalar_lea.hbm %s147_s0, 32 }
   0x2   :  { %s14_s7 = sshll.u32 %s110_s6, 4  ;;  %p63_p0 = scmp.ne.s32.totalorder %s147_s0, %s62_s10  ;;  %s15_s7 = int_to_ptr.vmem [resolvable:$true] %s14_s7 }
   0x3   :  { %p66_p1 = scmp.lt.u32.totalorder %s62_s10, %s147_s0 }
   0x5   :  { %p68_p2 = pnand %p66_p1, %p63_p0 }
   0x7   :  { %71 = shalt.err (!%p68_p2)
}
   0x8   :  { %s72_s15 = scalar_lea.vmem %s15_s7, 32  ;;  %p77_p4 = scmp.lt.s32.totalorder %s15_s7, %s15_s7 }
   0x9   :  { %p73_p3 = scmp.ne.s32.totalorder %s15_s7, %s72_s15  ;;  %p78_p5 = scmp.lt.s32.totalorder %s72_s15, %s72_s15 }
   0xb   :  { %p79_p6 = por %p78_p5, %p77_p4 }
   0xd   :  { %p80_p7 = pnand %p79_p6, %p73_p3 }
   0xf   :  { %83 = shalt.err (!%p80_p7)
}
  0x10   :  { %17 = dma.hbm_to_vmem [thread:$0]  %s147_s0, 32, %s15_s7, [#allocation3]  }
  0x11   :  { %106 = dma.done.wait [#allocation3], 32  }
  0x12   :  { %107 = vsyncadd [#allocation3], 4294967264  ;;  %v23_v0 = vlaneseq  ;;  %v111_v1 = vmov 1983009808   ;;  %v21_v7 = vld [vmem:[#allocation2] sm:$0x3] }
  0x13   :  { %v33_v2 = vunpack.c.l.s4 %v111_v1  ;;  %vm40_vm0 = vcmask 1041408   ;;  %vm41_vm1 = vcmask 551938   ;;  %s112_s18 = smov [#allocation5]  }
  0x14   :  { %v24_v3 = vshrl.u32 %v23_v0, 7  ;;  %s50_s19 = sshll.u32 %s112_s18, 4  ;;  %vm42_vm2 = vmor %vm41_vm1, %vm40_vm0  ;;  %s51_s19 = int_to_ptr.vmem [resolvable:$true] %s50_s19 }
  0x15   :  { %v34_v6 = vunpack.c.0.s8 %v33_v2  ;;  %s84_s0 = scalar_lea.vmem %s51_s19, 64  ;;  %p89_p9 = scmp.lt.s32.totalorder %s51_s19, %s51_s19 }
  0x16   :  { %v25_v4 = vsub.s32 0, %v24_v3  ;;  %v29_v5 = vsub.s32 1, %v24_v3  ;;  %p85_p8 = scmp.ne.s32.totalorder %s51_s19, %s84_s0  ;;  %p90_p10 = scmp.lt.s32.totalorder %s84_s0, %s84_s0 }
  0x17   :  { %v37_v10 = vsub.s32 %v34_v6, %v24_v3 }
  0x18   :  { %v26_v8 = vrot.slane %v21_v7, %v25_v4  ;;  %v30_v9 = vrot.slane %v21_v7, %v29_v5  ;;  %p91_p11 = por %p90_p10, %p89_p9 }
  0x1a   :  { %v31_v11 = vcombine.low %v26_v8, %v30_v9  ;;  %p92_p12 = pnand %p91_p11, %p85_p8 }
  0x1c   :  { %v38_v12 = vrot.slane %v31_v11, %v37_v10 }
  0x1e   :  { %43 = vst.msk [vmem:[#allocation5] sm:$0xf] %vm42_vm2, %v38_v12 }
  0x1f   :  { %95 = shalt.err (!%p92_p12)
}
  0x20   :  { %s96_s22 = scalar_lea.hbm %s148_s1, 64 }
  0x21   :  { %p97_p13 = scmp.ne.s32.totalorder %s148_s1, %s96_s22  ;;  %p100_p0 = scmp.lt.u32.totalorder %s96_s22, %s148_s1 }
  0x23   :  { %p102_p1 = pnand %p100_p0, %p97_p13 }
  0x25   :  { %105 = shalt.err (!%p102_p1)
}
  0x26   :  { %53 = dma.vmem_to_hbm [thread:$0]  %s51_s19, 64, %s148_s1, [#allocation4]  }
  0x27   :  { %108 = dma.done.wait [#allocation4], 64  }
  0x28   :  { %109 = vsyncadd [#allocation4], 4294967232 }
  0x29   :  { %57 = vsyncpa [#allocation3], 1 }
  0x2a   :  { %58 = vsyncpa [#allocation4], 1 }

</bundles_post_ra>
